<compile_context>
chip_gen: v7x
topology: tpu7x:2x2x1
jax: 0.10.0
libtpu: 0.0.40
codegen_flags: <defaults>
</compile_context>

<pallas_src>
import jax
import jax.numpy as jnp
from jax.experimental import pallas as pl
from jax.experimental.pallas import tpu as pltpu

_LANE = 128
_SUBLANE = 8


def _cdiv(a: int, b: int) -> int:
    return -(-a // b)


def _round_up(x: int, m: int) -> int:
    return _cdiv(x, m) * m


def _upconv_kernel(x_ref, w_ref, b_ref, o_ref):
    """One (batch, pixel-tile, R-tile) grid step: (TR, Cin) @ (Cin, TM) on the MXU."""
    # x_ref: (Cin, TM)  input dtype   w_ref: (TR, Cin)  compute dtype (bf16 default)
    # b_ref: (TR, 1)    float32       o_ref: (TR, TM)   output dtype
    x = x_ref[...].astype(w_ref.dtype)                 # in-VMEM cast -> MXU at bf16 rate
    acc = jnp.dot(w_ref[...], x, preferred_element_type=jnp.float32)
    o_ref[...] = (acc + b_ref[...]).astype(o_ref.dtype)  # single fused add+cast+store


def _choose_tiling(HW, Cin, R, x_bytes, w_bytes, o_bytes, n_batch, *,
                   max_tm, vmem_block_budget):
    """Pick lane tile tm, padded pixel count HWp, and R tile tr so that the
    double-buffered VMEM blocks stay inside `vmem_block_budget`."""
    HW128 = _round_up(HW, _LANE)

    # Candidate R-tile counts (tr must stay a multiple of the 8-row sublane, or == R).
    r_candidates = [1]
    n = 2
    while R % n == 0 and (R // n) >= _SUBLANE:
        if (R // n) % _SUBLANE == 0:
            r_candidates.append(n)
        n *= 2

    def tm_cap(n_r):
        tr = R // n_r
        resident = 2 * tr * Cin * w_bytes + 2 * tr * 4     # weight + bias blocks (dbl-buffered)
        per_lane = 2 * Cin * x_bytes + 2 * tr * o_bytes    # x + out blocks (dbl-buffered)
        avail = vmem_block_budget - resident
        if avail <= 0:
            return 0
        return (avail // per_lane) // _LANE * _LANE

    # Smallest number of R tiles that still allows a reasonably wide lane tile.
    target_tm = min(512, HW128)
    n_r = r_candidates[-1]
    for cand in r_candidates:
        if tm_cap(cand) >= target_tm:
            n_r = cand
            break

    tm = max(min(max_tm, tm_cap(n_r), HW128), _LANE)
    # Split the (128-padded) pixel axis into equal tiles to minimise padding slack.
    n_p = _cdiv(HW128, tm)
    tm = _round_up(_cdiv(HW128, n_p), _LANE)
    HWp = n_p * tm

    # v7x megacore: prefer >= 2 parallel grid points when only one would be left.
    if n_batch * n_p * n_r < 2:
        for cand in r_candidates:
            if cand >= 2 and tm_cap(cand) >= tm:
                n_r = cand
                break

    return tm, HWp, n_p, R // n_r, n_r


def upsample_forward(x_nchw, weight, bias, *,
                     compute_dtype=jnp.bfloat16,
                     max_tm=2048,
                     vmem_block_budget=36 * 1024 * 1024,
                     vmem_limit_bytes=48 * 1024 * 1024):
    """ConvTranspose2d(kernel=2, stride=2) forward, PyTorch semantics.

    x_nchw: (N, C_in, H, W)
    weight: (C_in, C_out, 2, 2)  (PyTorch ConvTranspose2d weight layout)
    bias:   (C_out,)
    returns (N, C_out, 2H, 2W) in x's dtype (f32 accumulation; bf16 MXU operands).
    """
    N, Cin, H, W = x_nchw.shape
    Cin_w, Cout, kH, kW = weight.shape
    assert Cin == Cin_w and kH == 2 and kW == 2

    R = kH * kW * Cout
    HW = H * W
    out_dtype = x_nchw.dtype
    x_bytes = jnp.dtype(x_nchw.dtype).itemsize
    w_bytes = jnp.dtype(compute_dtype).itemsize
    o_bytes = jnp.dtype(out_dtype).itemsize

    tm, HWp, n_p, tr, n_r = _choose_tiling(
        HW, Cin, R, x_bytes, w_bytes, o_bytes, N,
        max_tm=max_tm, vmem_block_budget=vmem_block_budget)

    # NCHW consumed directly: (N, Cin, H, W) -> (N, Cin, H*W) is a free dim merge.
    x3 = x_nchw.reshape(N, Cin, HW)
    if HWp != HW:
        x3 = jnp.pad(x3, ((0, 0), (0, 0), (0, HWp - HW)))

    # Weight: (Cin, Cout, kH, kW) -> (Cout, kH, kW, Cin) -> (R, Cin), r = (co*2+ki)*2+kj.
    w_mat = jnp.transpose(weight, (1, 2, 3, 0)).reshape(R, Cin).astype(compute_dtype)
    # Bias per flattened r (co slowest): [b0,b0,b0,b0, b1,...]; kept f32 for the add.
    b_mat = jnp.repeat(bias.astype(jnp.float32), kH * kW).reshape(R, 1)

    grid = (N, n_p, n_r)
    flops = 2 * N * HW * Cin * R
    bytes_accessed = (N * Cin * HWp * x_bytes + R * Cin * w_bytes + R * 4
                      + N * R * HWp * o_bytes)

    out_t = pl.pallas_call(
        _upconv_kernel,
        out_shape=jax.ShapeDtypeStruct((N, R, HWp), out_dtype),
        grid_spec=pl.GridSpec(
            grid=grid,
            in_specs=[
                # x block index ignores the (innermost) R-tile axis -> DMA'd once per (n, p).
                pl.BlockSpec((None, Cin, tm), lambda n, p, r: (n, 0, p)),
                pl.BlockSpec((tr, Cin), lambda n, p, r: (r, 0)),
                pl.BlockSpec((tr, 1), lambda n, p, r: (r, 0)),
            ],
            out_specs=pl.BlockSpec((None, tr, tm), lambda n, p, r: (n, r, p)),
        ),
        compiler_params=pltpu.CompilerParams(
            dimension_semantics=("parallel", "parallel", "parallel"),
            vmem_limit_bytes=vmem_limit_bytes,
        ),
        cost_estimate=pl.CostEstimate(
            flops=flops, transcendentals=0, bytes_accessed=bytes_accessed),
    )(x3, w_mat, b_mat)

    if HWp != HW:
        out_t = out_t[:, :, :HW]

    # (N, R, HW) -> (N, Cout, ki, kj, H, W) -> (N, Cout, H, ki, W, kj) -> (N, Cout, 2H, 2W)
    # (single remaining transpose; both reshapes are free dim merges/splits)
    out = out_t.reshape(N, Cout, kH, kW, H, W)
    out = jnp.transpose(out, (0, 1, 4, 2, 5, 3)).reshape(N, Cout, kH * H, kW * W)
    return out


def _reference(x_nchw, weight, bias):
    # Independent pure-JAX reference of the transposed-conv (stride==kernel) math.
    N, _, H, W = x_nchw.shape
    _, Cout, kH, kW = weight.shape
    y = jnp.einsum("nihw,iokl->nohklw", x_nchw, weight,
                   precision=jax.lax.Precision.HIGHEST)
    y = jnp.transpose(y, (0, 1, 2, 3, 5, 4)).reshape(N, Cout, kH * H, kW * W)
    return y + bias[None, :, None, None]


if __name__ == "__main__":
    key = jax.random.PRNGKey(0)
    fwd = jax.jit(upsample_forward)

    def run_case(N, Cin, Cout, H, W):
        kx, kw, kb = jax.random.split(jax.random.fold_in(key, N * 1000 + H), 3)
        x = jax.random.normal(kx, (N, Cin, H, W), dtype=jnp.float32)
        # PyTorch ConvTranspose2d weight shape: (in_channels, out_channels, kH, kW)
        weight = jax.random.normal(kw, (Cin, Cout, 2, 2), dtype=jnp.float32) * 0.1
        bias = jax.random.normal(kb, (Cout,), dtype=jnp.float32) * 0.1

        out = jax.block_until_ready(fwd(x, weight, bias))
        assert out.shape == (N, Cout, 2 * H, 2 * W), out.shape

        # Reference with the same bf16 operand rounding but pure f32 math.
        xr = x.astype(jnp.bfloat16).astype(jnp.float32)
        wr = weight.astype(jnp.bfloat16).astype(jnp.float32)
        ref = jax.block_until_ready(_reference(xr, wr, bias))
        err = float(jnp.max(jnp.abs(out - ref)))
        assert err < 1e-3, err

    run_case(2, 4, 8, 16, 16)   # aligned HW (256): no padding path
    run_case(1, 3, 5, 7, 9)     # ragged HW (63 -> padded to 128), odd channel counts
    print("KERNEL_OK")
</pallas_src>

<mosaic_0001>
module attributes {stable_mosaic.version = 11 : i64} {
  func.func @_upconv_kernel(%arg0: i32, %arg1: i32, %arg2: i32, %arg3: memref<1x4x256xf32, #tpu.memory_space<vmem>>, %arg4: memref<32x4xbf16, #tpu.memory_space<vmem>>, %arg5: memref<32x1xf32, #tpu.memory_space<vmem>>, %arg6: memref<1x32x256xf32, #tpu.memory_space<vmem>>) attributes {dimension_semantics = [#tpu.dimension_semantics<parallel>, #tpu.dimension_semantics<parallel>, #tpu.dimension_semantics<parallel>], iteration_bounds = array<i64: 2, 1, 1>, scalar_prefetch = 0 : i64, scratch_operands = 0 : i64, tpu.core_type = #tpu.core_type<tc>, window_params = [{transform_indices = @transform_0, window_bounds = array<i64: 1, 4, 256>}, {transform_indices = @transform_1, window_bounds = array<i64: 32, 4>}, {transform_indices = @transform_2, window_bounds = array<i64: 32, 1>}, {transform_indices = @transform_3, window_bounds = array<i64: 1, 32, 256>}]} {
    %c0 = arith.constant 0 : index
    %c0_0 = arith.constant 0 : index
    %c0_1 = arith.constant 0 : index
    %0 = vector.load %arg3[%c0, %c0_0, %c0_1] : memref<1x4x256xf32, #tpu.memory_space<vmem>>, vector<1x4x256xf32>
    %1 = vector.shape_cast %0 : vector<1x4x256xf32> to vector<4x256xf32>
    %2 = arith.truncf %1 : vector<4x256xf32> to vector<4x256xbf16>
    %c0_2 = arith.constant 0 : index
    %c0_3 = arith.constant 0 : index
    %3 = vector.load %arg4[%c0_2, %c0_3] : memref<32x4xbf16, #tpu.memory_space<vmem>>, vector<32x4xbf16>
    %cst = arith.constant dense<0.000000e+00> : vector<32x256xf32>
    %4 = tpu.matmul %3, %2, %cst {dimension_numbers = #tpu.dot_dimension_numbers<[1], [0], [0], [1], [0, 0, 1, 1], [], []>} : vector<32x4xbf16>, vector<4x256xbf16>, vector<32x256xf32> -> vector<32x256xf32>
    %c0_4 = arith.constant 0 : index
    %c0_5 = arith.constant 0 : index
    %5 = vector.load %arg5[%c0_4, %c0_5] : memref<32x1xf32, #tpu.memory_space<vmem>>, vector<32x1xf32>
    %6 = vector.broadcast %5 : vector<32x1xf32> to vector<32x256xf32>
    %7 = arith.addf %4, %6 : vector<32x256xf32>
    %c0_6 = arith.constant 0 : index
    %c0_7 = arith.constant 0 : index
    %c0_8 = arith.constant 0 : index
    %8 = vector.load %arg6[%c0_6, %c0_7, %c0_8] : memref<1x32x256xf32, #tpu.memory_space<vmem>>, vector<1x32x256xf32>
    %9 = vector.shape_cast %8 : vector<1x32x256xf32> to vector<32x256xf32>
    %10 = vector.shape_cast %7 : vector<32x256xf32> to vector<1x32x256xf32>
    tpu.vector_store %arg6[%c0_6, %c0_7, %c0_8], %10 {strides = array<i32>} : memref<1x32x256xf32, #tpu.memory_space<vmem>>, vector<1x32x256xf32>,
    return
  }
  func.func @transform_0(%arg0: i32, %arg1: i32, %arg2: i32) -> (i32, i32, i32) {
    %c0_i32 = arith.constant 0 : i32
    %c0_i32_0 = arith.constant 0 : i32
    return %arg0, %c0_i32, %arg1 : i32, i32, i32
  }
  func.func @transform_1(%arg0: i32, %arg1: i32, %arg2: i32) -> (i32, i32) {
    %c0_i32 = arith.constant 0 : i32
    %c0_i32_0 = arith.constant 0 : i32
    return %arg2, %c0_i32 : i32, i32
  }
  func.func @transform_2(%arg0: i32, %arg1: i32, %arg2: i32) -> (i32, i32) {
    %c0_i32 = arith.constant 0 : i32
    %c0_i32_0 = arith.constant 0 : i32
    return %arg2, %c0_i32 : i32, i32
  }
  func.func @transform_3(%arg0: i32, %arg1: i32, %arg2: i32) -> (i32, i32, i32) {
    %c0_i32 = arith.constant 0 : i32
    return %arg0, %arg2, %arg1 : i32, i32, i32
  }
}

</mosaic_0001>

<bundles_post_ra>
// kernel: upsample_forward.1
= control target key start
LH: loop header
LB: loop body
LE: loop exit
PB: predicated region body
PF: predicated region fallthrough
CT: control target
= control target key end

     0   :  { %s630_s12 = smov 0   ;;  %s632_s13 = smov 0   ;;  %s685_s0 = inlined_call_operand.vmem [shape: f32[2,4,256], index: 0, kind: input, shape index: {}]   ;;  %s686_s1 = inlined_call_operand.vmem [shape: bf16[32,4], index: 1, kind: input, shape index: {}]   ;;  %s687_s2 = inlined_call_operand.vmem [shape: f32[32,1], index: 2, kind: input, shape index: {}]   ;;  %s688_s3 = inlined_call_operand.vmem [shape: f32[2,32,256], index: 3, kind: output, shape index: {}]  }
   0x1   :  { %s634_s14 = smov 0  }
   0x2 LB: > { %s32_s15 = sadd.s32 1, %s603_s13  ;;  %p539_p0 = scmp.ge.s32.totalorder %s607_s14, 1  ;;  %s607_s14 = sphi %s634_s14, %s13_s14   ;;  %s603_s13 = sphi %s632_s13, %s690_s13   ;;  %s599_s12 = sphi %s630_s12, %s689_s12  }
   0x3   : > { %p34_p1 = scmp.ge.s32.totalorder %s32_s15, 2  ;;  %p189_p2 = scmp.lt.s32.totalorder %s607_s14, 3 }
   0x5   : > { %s692_s15 = smov (%p34_p1, %s32_s15), 0  ;;  %p190_p3 = pnand %p539_p0, %p189_p2 }
   0x6   : > { %p237_p4 = scmp.lt.s32.totalorder (!%p190_p3), %s599_s12, 1  ;;  %v609_v0 = vmov (!%p190_p3), 0   ;;  %v287_v1 = vld [vmem:[%s687_s2 + $0x10] sm:$0xff] (!%p190_p3)  ;;  %v285_v2 = vld [vmem:[%s687_s2] sm:$0xff] (!%p190_p3)  ;;  %v288_v3 = vld [vmem:[%s687_s2 + $0x18] sm:$0xff] (!%p190_p3)  ;;  %vm326_vm0 = vcmask (!%p190_p3), 1041408  }
   0x7   : > { %193 = sbr.rel (%p190_p3) target bundleno = 244 (0xf4), region = 32  ;;  %365 = vmatprep.mubr.bf16.mxu0 (!%p190_p3), %v609_v0  ;;  %375 = vmatprep.mubr.bf16.mxu1 (!%p190_p3), %v609_v0  ;;  %v286_v4 = vld [vmem:[%s687_s2 + $0x8] sm:$0xff] (!%p190_p3)  ;;  %v583_v10 = vld [vmem:[%s686_s1] sm:$0xff] (!%p190_p3)   ;;  %vm319_vm1 = vcmask (!%p190_p3), 31744  }
   0x8   : > { %581 = vset.pattern.permute.xlu1 (!%p190_p3), %v609_v0  ;;  %580 = vset.pattern.permute.xlu0 (!%p190_p3), %v609_v0  ;;  %v584_v11 = vld [vmem:[%s686_s1 + $0x8] sm:$0xff] (!%p190_p3)  }
   0x9   : > { %301 = vperm.xlu1 (!%p190_p3), %581, %v287_v1   ;;  %291 = vperm.xlu0 (!%p190_p3), %580, %v285_v2  }
   0xd   : > { %306 = vperm.xlu1 (!%p190_p3), %581, %v288_v3   ;;  %296 = vperm.xlu0 (!%p190_p3), %580, %v286_v4  }
   0xe   : > { %s694_s12 = smov (!%p237_p4, %s599_s12), 1 }
   0xf   : > { %s551_s20 = sshll.u32 %s694_s12, 3  ;;  %s552_s5 = sshll.u32 %s694_s12, 6 }
  0x10   : > { %s244_s27 = scalar_lea.vmem %s685_s0, %s551_s20  ;;  %s271_s8 = scalar_lea.vmem %s688_s3, %s552_s5 }
  0x11   : > { %v275_v5 = vld [vmem:[%s244_s27] sm:$0xff] }
  0x12   : > { %v277_v6 = vcombine.high %v275_v5, %v275_v5  ;;  %v279_v7 = vpack.c.bf16 %v275_v5, %v275_v5 }
  0x14   : > { %v280_v8 = vpack.c.bf16 %v277_v6, %v277_v6  ;;  %v328_v9 = vsel %vm326_vm0, %v279_v7, 0 }
  0x16   : > { %546 = vmatprep.subr.msk.bf16.mxu0 %vm326_vm0, %v280_v8  ;;  %553 = vmatprep.subr.msk.bf16.mxu1 %vm326_vm0, %v280_v8 }
  0x17   : > { %334 = vmatpush1.bf16.msra.mxu0 %v328_v9  ;;  %554 = vmatpush1.bf16.msra.mxu1 %v328_v9 }
  0x1a   : > { %547 = vmatmul.mubr.msk.bf16.vlgmr.msra.gmra.mrb[0].mxu0 %vm319_vm1, %v583_v10  ;;  %548 = vmatmul.mubr.msk.bf16.vlgmr.msra.gmra.mrb[0].mxu1 %vm319_vm1, %v584_v11 }
  0x88   : > { %v302_v12 = vpop.permute.xlu1 %301  ;;  %v292_v13 = vpop.permute.xlu0 %291 }
  0x8c   : > { %v307_v14 = vpop.permute.xlu1 %306  ;;  %v297_v15 = vpop.permute.xlu0 %296 }
  0xed   : > { %v367_v16 = vpop.f32.mrb[0].mxu0  ;;  %v377_v17 = vpop.f32.mrb[0].mxu1 }
  0xee   : > { %v368_v18 = vadd.f32 %v367_v16, %v292_v13  ;;  %v378_v19 = vadd.f32 %v377_v17, %v302_v12  ;;  %v369_v20 = vpop.f32.mrb[1].mxu0  ;;  %v379_v21 = vpop.f32.mrb[1].mxu1 }
  0xef   : > { %v370_v22 = vadd.f32 %v369_v20, %v292_v13  ;;  %v380_v23 = vadd.f32 %v379_v21, %v302_v12  ;;  %v371_v24 = vpop.f32.mrb[2].mxu0  ;;  %v381_v25 = vpop.f32.mrb[2].mxu1 }
  0xf0   : > { %386 = vst [vmem:[%s271_s8] sm:$0xff] %v368_v18  ;;  %390 = vst [vmem:[%s271_s8 + $0x20] sm:$0xff] %v378_v19  ;;  %v372_v26 = vadd.f32 %v371_v24, %v297_v15  ;;  %v382_v27 = vadd.f32 %v381_v25, %v307_v14  ;;  %v373_v28 = vpop.f32.mrb[3].mxu0  ;;  %v383_v29 = vpop.f32.mrb[3].mxu1 }
  0xf1   : > { %387 = vst [vmem:[%s271_s8 + $0x8] sm:$0xff] %v370_v22  ;;  %391 = vst [vmem:[%s271_s8 + $0x28] sm:$0xff] %v380_v23  ;;  %v374_v30 = vadd.f32 %v373_v28, %v297_v15  ;;  %v384_v31 = vadd.f32 %v383_v29, %v307_v14 }
  0xf2   : > { %388 = vst [vmem:[%s271_s8 + $0x10] sm:$0xff] %v372_v26  ;;  %392 = vst [vmem:[%s271_s8 + $0x30] sm:$0xff] %v382_v27 }
  0xf3   : > { %389 = vst [vmem:[%s271_s8 + $0x18] sm:$0xff] %v374_v30  ;;  %393 = vst [vmem:[%s271_s8 + $0x38] sm:$0xff] %v384_v31 }
  0xf4 PF: > { %s13_s14 = sadd.s32 1, %s607_s14   ;;  %s689_s12 = smov %s603_s13 }
  0xf5   : > { %p10_p5 = scmp.ge.s32.totalorder %s13_s14, 4   ;;  %s690_s13 = smov %s692_s15 }
  0xf7   :  { %12 = sbr.rel (!%p10_p5) target bundleno = 2 (0x2), region = 68 }

</bundles_post_ra>
